<compile_context>
chip_gen: v6e
topology: v6e:2x2x1
jax: 0.10.0
libtpu: 0.0.40
codegen_flags: <defaults>
</compile_context>

<pallas_src>
import functools

import jax
import jax.numpy as jnp
from jax.experimental import pallas as pl
from jax.experimental.pallas import tpu as pltpu


def _round_up(x, m):
    return (x + m - 1) // m * m


def _approx_measure_loss_kernel(x0_ref, x1_ref, y_ref, o_ref, ssq_ref, *,
                                feat_dim, tkd, ragged_d):
    k = pl.program_id(1)               # feature-tile index (reduction, last axis)
    nk = pl.num_programs(1)

    # ---- hot path: diff + square, VALU-only --------------------------------
    diff = x0_ref[...].astype(jnp.float32) - x1_ref[...].astype(jnp.float32)
    if ragged_d:
        # Boundary-block contents are unspecified -> select BEFORE squaring.
        col = jax.lax.broadcasted_iota(jnp.int32, diff.shape, 1) + k * tkd
        diff = jnp.where(col < feat_dim, diff, 0.0)
    d2 = diff * diff                                    # (tb, tkd)

    # Fold tkd lanes down to 128 with static 128-lane slice adds (no XLU).
    partial = d2[:, 0:128]
    for g in range(1, tkd // 128):
        partial = partial + d2[:, g * 128:(g + 1) * 128]

    @pl.when(k == 0)
    def _():
        ssq_ref[...] = partial

    @pl.when(k > 0)
    def _():
        ssq_ref[...] += partial

    # ---- epilogue: once per batch tile -------------------------------------
    @pl.when(k == nk - 1)
    def _():
        ssq = jnp.sum(ssq_ref[...], axis=1, keepdims=True)   # (tb, 1) single XLU reduce
        dist = jnp.sqrt(ssq)
        o_ref[...] = jnp.abs(dist - y_ref[...].astype(jnp.float32))


def _vmem_capacity_bytes():
    try:
        return int(pltpu.get_tpu_info().vmem_capacity_bytes)
    except Exception:
        return 64 * 1024 * 1024            # conservative fallback (v7x per-core VMEM)


def _select_tiles(bs, d, itemsize):
    """Pick (tb, tkd) from a generation-aware VMEM budget."""
    cap = _vmem_capacity_bytes()
    # Inputs x 2 pipeline buffers + f32 elementwise temporaries <= budget.
    budget = min(24 * 1024 * 1024, cap // 3)

    d_pad = _round_up(d, 128)
    tkd = d_pad if d_pad <= 8192 else 4096     # full-D tile when moderate -> 1-D grid

    def row_bytes(tkd_):
        # x0/x1 double-buffered + two f32 temporaries (diff, d2), per batch row.
        return tkd_ * (4 * itemsize + 8)

    tb_cap = (budget // row_bytes(tkd)) // 8 * 8
    while tb_cap < 8 and tkd > 128:
        tkd = max(128, _round_up(tkd // 2, 128))
        tb_cap = (budget // row_bytes(tkd)) // 8 * 8
    tb_cap = min(max(tb_cap, 8), 1024)

    tb = min(_round_up(bs, 8), tb_cap)
    return tb, tkd


def approx_measure_loss(x0, x1, y):
    """Pallas implementation of ApproxMeasureLoss.forward((x0, x1), y)."""
    bs, d = x0.shape
    assert x1.shape == (bs, d)
    assert y.shape == (bs, 1)

    itemsize = jnp.dtype(x0.dtype).itemsize
    tb, tkd = _select_tiles(bs, d, itemsize)
    nb = pl.cdiv(bs, tb)
    nk = pl.cdiv(d, tkd)
    ragged_d = (d % tkd) != 0

    kernel = functools.partial(_approx_measure_loss_kernel,
                               feat_dim=d, tkd=tkd, ragged_d=ragged_d)

    # Per-step VMEM footprint: inputs (double-buffered) + f32 temps + y/out/ssq.
    footprint = (tb * tkd * (4 * itemsize + 8)
                 + tb * (2 * itemsize + 2 * 4 + 128 * 4))
    vmem_limit = int(min(_vmem_capacity_bytes(),
                         max(footprint + 8 * 1024 * 1024, 16 * 1024 * 1024)))

    cost = pl.CostEstimate(
        flops=3 * bs * d,
        transcendentals=bs,
        bytes_accessed=2 * bs * d * itemsize + bs * itemsize + bs * 4,
    )

    err = pl.pallas_call(
        kernel,
        out_shape=jax.ShapeDtypeStruct((bs, 1), jnp.float32),
        grid_spec=pltpu.PrefetchScalarGridSpec(
            num_scalar_prefetch=0,
            grid=(nb, nk),
            in_specs=[
                pl.BlockSpec((tb, tkd), lambda i, k: (i, k)),
                pl.BlockSpec((tb, tkd), lambda i, k: (i, k)),
                pl.BlockSpec((tb, 1), lambda i, k: (i, 0)),
            ],
            out_specs=pl.BlockSpec((tb, 1), lambda i, k: (i, 0)),
            scratch_shapes=[
                pltpu.VMEM((tb, 128), jnp.float32),   # per-row partial sum of squares
            ],
        ),
        compiler_params=pltpu.CompilerParams(
            # Batch axis has no cross-tile state -> parallel (both v7x TCs).
            dimension_semantics=("parallel", "arbitrary"),
            vmem_limit_bytes=vmem_limit,
        ),
        cost_estimate=cost,
    )(x0, x1, y)

    # Tiny final reduce in XLA: mean over the true bs rows.
    return jnp.mean(err)


def _reference(x0, x1, y):
    dist = jnp.sqrt(jnp.sum((x0 - x1) ** 2, axis=1, keepdims=True))
    return jnp.mean(jnp.abs(dist - y))


if __name__ == "__main__":
    # Aligned shapes.
    k0, k1, k2 = jax.random.split(jax.random.PRNGKey(0), 3)
    bs, d = 16, 128
    x0 = jax.random.normal(k0, (bs, d), dtype=jnp.float32)
    x1 = jax.random.normal(k1, (bs, d), dtype=jnp.float32)
    y = jax.random.uniform(k2, (bs, 1), dtype=jnp.float32) * 10.0

    loss = approx_measure_loss(x0, x1, y)
    jax.block_until_ready(loss)
    ref = _reference(x0, x1, y)
    assert jnp.allclose(loss, ref, rtol=1e-5, atol=1e-5), (loss, ref)

    # Ragged (unaligned) shapes: exercises the in-kernel lane masking and
    # ragged batch-tile handling (no wrapper padding anywhere).
    k3, k4, k5 = jax.random.split(jax.random.PRNGKey(1), 3)
    bs_r, d_r = 10, 200
    a0 = jax.random.normal(k3, (bs_r, d_r), dtype=jnp.float32)
    a1 = jax.random.normal(k4, (bs_r, d_r), dtype=jnp.float32)
    yr = jax.random.uniform(k5, (bs_r, 1), dtype=jnp.float32) * 10.0

    loss_r = approx_measure_loss(a0, a1, yr)
    jax.block_until_ready(loss_r)
    ref_r = _reference(a0, a1, yr)
    assert jnp.allclose(loss_r, ref_r, rtol=1e-5, atol=1e-5), (loss_r, ref_r)

    print("KERNEL_OK")
</pallas_src>

<mosaic_0001>
module attributes {stable_mosaic.version = 11 : i64} {
  func.func @_approx_measure_loss_kernel(%arg0: i32, %arg1: i32, %arg2: memref<16x128xf32, #tpu.memory_space<vmem>>, %arg3: memref<16x128xf32, #tpu.memory_space<vmem>>, %arg4: memref<16x1xf32, #tpu.memory_space<vmem>>, %arg5: memref<16x1xf32, #tpu.memory_space<vmem>>, %arg6: memref<16x128xf32, #tpu.memory_space<vmem>>) attributes {dimension_semantics = [#tpu.dimension_semantics<parallel>, #tpu.dimension_semantics<arbitrary>], iteration_bounds = array<i64: 1, 1>, scalar_prefetch = 0 : i64, scratch_operands = 1 : i64, tpu.core_type = #tpu.core_type<tc>, window_params = [{transform_indices = @transform_0, window_bounds = array<i64: 16, 128>}, {transform_indices = @transform_1, window_bounds = array<i64: 16, 128>}, {transform_indices = @transform_2, window_bounds = array<i64: 16, 1>}, {transform_indices = @transform_3, window_bounds = array<i64: 16, 1>}]} {
    %c0 = arith.constant 0 : index
    %c0_0 = arith.constant 0 : index
    %0 = vector.load %arg2[%c0, %c0_0] : memref<16x128xf32, #tpu.memory_space<vmem>>, vector<16x128xf32>
    %c0_1 = arith.constant 0 : index
    %c0_2 = arith.constant 0 : index
    %1 = vector.load %arg3[%c0_1, %c0_2] : memref<16x128xf32, #tpu.memory_space<vmem>>, vector<16x128xf32>
    %2 = arith.subf %0, %1 : vector<16x128xf32>
    %3 = arith.mulf %2, %2 : vector<16x128xf32>
    %c0_i32 = arith.constant 0 : i32
    %4 = arith.cmpi eq, %arg1, %c0_i32 : i32
    %5 = arith.extui %4 : i1 to i32
    %c0_i32_3 = arith.constant 0 : i32
    %6 = arith.cmpi ne, %5, %c0_i32_3 : i32
    scf.if %6 {
      %c0_8 = arith.constant 0 : index
      %c0_9 = arith.constant 0 : index
      %13 = vector.load %arg6[%c0_8, %c0_9] : memref<16x128xf32, #tpu.memory_space<vmem>>, vector<16x128xf32>
      tpu.vector_store %arg6[%c0_8, %c0_9], %3 {strides = array<i32>} : memref<16x128xf32, #tpu.memory_space<vmem>>, vector<16x128xf32>,
    } else {
    }
    %c0_i32_4 = arith.constant 0 : i32
    %7 = arith.cmpi sgt, %arg1, %c0_i32_4 : i32
    %8 = arith.extui %7 : i1 to i32
    %c0_i32_5 = arith.constant 0 : i32
    %9 = arith.cmpi ne, %8, %c0_i32_5 : i32
    scf.if %9 {
      %c0_8 = arith.constant 0 : index
      %c0_9 = arith.constant 0 : index
      %13 = vector.load %arg6[%c0_8, %c0_9] : memref<16x128xf32, #tpu.memory_space<vmem>>, vector<16x128xf32>
      %14 = arith.addf %13, %3 : vector<16x128xf32>
      %c0_10 = arith.constant 0 : index
      %c0_11 = arith.constant 0 : index
      %15 = vector.load %arg6[%c0_10, %c0_11] : memref<16x128xf32, #tpu.memory_space<vmem>>, vector<16x128xf32>
      tpu.vector_store %arg6[%c0_10, %c0_11], %14 {strides = array<i32>} : memref<16x128xf32, #tpu.memory_space<vmem>>, vector<16x128xf32>,
    } else {
    }
    %c0_i32_6 = arith.constant 0 : i32
    %10 = arith.cmpi eq, %arg1, %c0_i32_6 : i32
    %11 = arith.extui %10 : i1 to i32
    %c0_i32_7 = arith.constant 0 : i32
    %12 = arith.cmpi ne, %11, %c0_i32_7 : i32
    scf.if %12 {
      %c0_8 = arith.constant 0 : index
      %c0_9 = arith.constant 0 : index
      %13 = vector.load %arg6[%c0_8, %c0_9] : memref<16x128xf32, #tpu.memory_space<vmem>>, vector<16x128xf32>
      %cst = arith.constant dense<0.000000e+00> : vector<16xf32>
      %14 = vector.multi_reduction <add>, %13, %cst [1] : vector<16x128xf32> to vector<16xf32>
      %15 = vector.shape_cast %14 : vector<16xf32> to vector<16x1xf32>
      %16 = math.sqrt %15 : vector<16x1xf32>
      %c0_10 = arith.constant 0 : index
      %c0_11 = arith.constant 0 : index
      %17 = vector.load %arg4[%c0_10, %c0_11] : memref<16x1xf32, #tpu.memory_space<vmem>>, vector<16x1xf32>
      %18 = arith.subf %16, %17 : vector<16x1xf32>
      %19 = math.absf %18 : vector<16x1xf32>
      %c0_12 = arith.constant 0 : index
      %c0_13 = arith.constant 0 : index
      %20 = vector.load %arg5[%c0_12, %c0_13] : memref<16x1xf32, #tpu.memory_space<vmem>>, vector<16x1xf32>
      tpu.vector_store %arg5[%c0_12, %c0_13], %19 {strides = array<i32>} : memref<16x1xf32, #tpu.memory_space<vmem>>, vector<16x1xf32>,
    } else {
    }
    return
  }
  func.func @transform_0(%arg0: i32, %arg1: i32) -> (i32, i32) {
    %c0_i32 = arith.constant 0 : i32
    return %arg0, %arg1 : i32, i32
  }
  func.func @transform_1(%arg0: i32, %arg1: i32) -> (i32, i32) {
    %c0_i32 = arith.constant 0 : i32
    return %arg0, %arg1 : i32, i32
  }
  func.func @transform_2(%arg0: i32, %arg1: i32) -> (i32, i32) {
    %c0_i32 = arith.constant 0 : i32
    %c0_i32_0 = arith.constant 0 : i32
    return %arg0, %c0_i32 : i32, i32
  }
  func.func @transform_3(%arg0: i32, %arg1: i32) -> (i32, i32) {
    %c0_i32 = arith.constant 0 : i32
    %c0_i32_0 = arith.constant 0 : i32
    return %arg0, %c0_i32 : i32, i32
  }
}

</mosaic_0001>

<bundles_post_ra>
// kernel: tpu_custom_call.1
= control target key start
LH: loop header
LB: loop body
LE: loop exit
PB: predicated region body
PF: predicated region fallthrough
CT: control target
= control target key end

     0   :  { %8 = vsyncpa [#allocation4], 0  ;;  %s118_s12 = smov [#allocation3]   ;;  %s162_s0 = inlined_call_operand.vmem [shape: f32[16,128], index: 0, kind: input, shape index: {}]   ;;  %s163_s1 = inlined_call_operand.hbm [shape: f32[16,128], index: 1, kind: input, shape index: {}]   ;;  %s164_s2 = inlined_call_operand.vmem [shape: f32[16,1], index: 2, kind: input, shape index: {}]   ;;  %s165_s3 = inlined_call_operand.vmem [shape: f32[16,1], index: 3, kind: output, shape index: {}]  }
   0x1   :  { %s16_s13 = sshll.u32 %s118_s12, 4  ;;  %s17_s13 = int_to_ptr.vmem [resolvable:$true] %s16_s13 }
   0x2   :  { %s104_s14 = scalar_lea.vmem %s17_s13, 256  ;;  %p109_p1 = scmp.lt.s32.totalorder %s17_s13, %s17_s13 }
   0x3   :  { %p105_p0 = scmp.ne.s32.totalorder %s17_s13, %s104_s14  ;;  %p110_p2 = scmp.lt.s32.totalorder %s104_s14, %s104_s14 }
   0x5   :  { %p111_p3 = por %p110_p2, %p109_p1 }
   0x7   :  { %p112_p4 = pnand %p111_p3, %p105_p0 }
   0x9   :  { %115 = shalt.err (!%p112_p4)
}
   0xa   :  { %s119_s15 = smov 128   ;;  %s120_s16 = smov 8  }
   0xb   :  { %22 = dma.hbm_to_vmem [thread:$0]  %s163_s1, 256, %s17_s13, [#allocation4], %s119_s15, %s119_s15, %s120_s16  }
   0xc   :  { %116 = dma.done.wait [#allocation4], 256  }
   0xd   :  { %117 = vsyncadd [#allocation4], 4294967040  ;;  %v28_v0 = vld [vmem:[%s162_s0] sm:$0xff]  ;;  %v29_v2 = vld [vmem:[%s162_s0 + $0x8] sm:$0xff]  ;;  %vm81_vm2 = vcmask 7168  }
   0xe   :  { %v30_v1 = vld [vmem:[#allocation3] sm:$0xff]  ;;  %v31_v4 = vld [vmem:[#allocation3 + $0x8] sm:$0xff] }
   0xf   :  { %v32_v3 = vsub.f32 %v28_v0, %v30_v1  ;;  %v33_v5 = vsub.f32 %v29_v2, %v31_v4  ;;  %v75_v12 = vld [vmem:[%s164_s2] sm:$0xff]  ;;  %v76_v19 = vld [vmem:[%s164_s2 + $0x8] sm:$0xff] }
  0x11   :  { %v34_v6 = vmul.f32 %v32_v3, %v32_v3  ;;  %v35_v7 = vmul.f32 %v33_v5, %v33_v5 }
  0x13   :  { %57 = vadd.xlane.f32.xlu0 %v34_v6 }
  0x17   :  { %59 = vadd.xlane.f32.xlu0 %v35_v7 }
  0x9c   :  { %v58_v8 = vpop.xlane.xlu0 %57 }
  0x9d   :  { %92 = vrsqrt.f32 %v58_v8  ;;  %vm63_vm0 = vcmp.eq.f32.partialorder %v58_v8, inf  ;;  %v66_v13 = vand.u32 2147483648, %v58_v8  ;;  %vm65_vm1 = vcmp.eq.f32.partialorder %v58_v8, 0.0 }
  0xa0   :  { %v60_v9 = vpop.xlane.xlu0 %59 }
  0xa1   :  { %94 = vrsqrt.f32 %v60_v9  ;;  %vm70_vm3 = vcmp.eq.f32.partialorder %v60_v9, inf  ;;  %v73_v20 = vand.u32 2147483648, %v60_v9  ;;  %vm72_vm4 = vcmp.eq.f32.partialorder %v60_v9, 0.0 }
  0xaa   :  { %v93_v10 = vpop.eup %92 }
  0xab   :  { %v62_v11 = vmul.f32 %v93_v10, %v58_v8 }
  0xad   :  { %v64_v14 = vsel %vm63_vm0, %v58_v8, %v62_v11 }
  0xae   :  { %v95_v15 = vpop.eup %94  ;;  %v67_v16 = vsel %vm65_vm1, %v66_v13, %v64_v14 }
  0xaf   :  { %v77_v17 = vsub.f32 %v67_v16, %v75_v12  ;;  %v69_v18 = vmul.f32 %v95_v15, %v60_v9 }
  0xb1   :  { %v79_v21 = vand.u32 2147483647, %v77_v17  ;;  %v71_v22 = vsel %vm70_vm3, %v60_v9, %v69_v18 }
  0xb2   :  { %v74_v23 = vsel %vm72_vm4, %v73_v20, %v71_v22 }
  0xb3   :  { %82 = vst.msk [vmem:[%s165_s3] sm:$0xff] %vm81_vm2, %v79_v21  ;;  %v78_v24 = vsub.f32 %v74_v23, %v76_v19 }
  0xb5   :  { %v80_v25 = vand.u32 2147483647, %v78_v24 }
  0xb7   :  { %83 = vst.msk [vmem:[%s165_s3 + $0x8] sm:$0xff] %vm81_vm2, %v80_v25 }
  0xb8   :  { %88 = vsyncpa [#allocation4], 1 }

</bundles_post_ra>
